<compile_context>
chip_gen: v7x
topology: tpu7x:2x2x1
jax: 0.10.0
libtpu: 0.0.40
codegen_flags: <defaults>
</compile_context>

<pallas_src>
import functools

import jax
import jax.numpy as jnp
from jax.experimental import pallas as pl
from jax.experimental.pallas import tpu as pltpu

LANE = 128


def _vmem_capacity_bytes():
    """Physical VMEM per TensorCore (generation-aware), conservative fallback."""
    try:
        return int(pltpu.get_tpu_info().vmem_capacity_bytes)
    except Exception:
        return 64 * 1024 * 1024   # v7x-sized fallback: safe on every generation


def _derive_vmem_limit(vmem_cap):
    # Leave ~16 MiB of physical VMEM for Mosaic-internal scratch / weights / sems;
    # the 100 MiB ceiling is known-safe on 128 MiB parts, and on v7x this yields 48 MiB.
    return int(min(max(32 << 20, vmem_cap - (16 << 20)), 100 << 20))


def _fused_fc_scale(avg, mx, w1, w2):
    """sigmoid(fc(avg) + fc(mx)) with both branches fused into one (C, 2) MXU pass.

    The (C, 2) pack uses iota+where rather than a lane-axis concatenate: a 1-lane
    concat is a lowering corner case, while the two selects cost only ~2*C VALU ops
    and the whole FC is negligible next to the HBM-bound pooling/multiply.
    """
    c = avg.shape[0]
    col = jax.lax.broadcasted_iota(jnp.int32, (c, 2), 1)
    p2 = jnp.where(col == 0, avg, mx)                                          # (C, 2)
    h = jnp.maximum(jnp.dot(w1, p2, preferred_element_type=jnp.float32), 0.0)  # (hid, 2)
    s = jnp.dot(w2, h, preferred_element_type=jnp.float32)                     # (C, 2)
    return jax.nn.sigmoid(s[:, 0:1] + s[:, 1:2])                               # (C, 1)


# ----------------------------- single-pass kernel ----------------------------------

def _single_pass_kernel(x_ref, w1_ref, w2_ref, o_ref, *, inv_hw):
    # x_ref: (C, HW) with HW == full array dim (no padding; Mosaic masks internally).
    # Pooling accumulates in f32; the f32 copy's live range ends at the reductions —
    # the final multiply re-reads x_ref and runs in the native dtype (bf16 stays bf16).
    xf = x_ref[...].astype(jnp.float32)
    avg = jnp.sum(xf, axis=-1, keepdims=True) * inv_hw                        # (C, 1)
    mx = jnp.max(xf, axis=-1, keepdims=True)                                  # (C, 1)
    scale = _fused_fc_scale(avg, mx, w1_ref[...], w2_ref[...])                # (C, 1) f32
    o_ref[...] = (scale.astype(o_ref.dtype) * x_ref[...]).astype(o_ref.dtype)


def _channel_attention_single_pass(x3, w1, w2, vmem_limit):
    B, C, HW = x3.shape
    hidden = w1.shape[0]
    itemsize = x3.dtype.itemsize
    w_bytes = w1.size * w1.dtype.itemsize + w2.size * w2.dtype.itemsize

    cost = pl.CostEstimate(
        flops=int(B * (3 * C * HW + 8 * hidden * C)),
        transcendentals=int(B * C),
        bytes_accessed=int(2 * B * C * HW * itemsize + w_bytes),
    )

    return pl.pallas_call(
        functools.partial(_single_pass_kernel, inv_hw=1.0 / HW),
        out_shape=jax.ShapeDtypeStruct((B, C, HW), x3.dtype),
        grid_spec=pltpu.PrefetchScalarGridSpec(
            num_scalar_prefetch=0,
            grid=(B,),
            in_specs=[
                pl.BlockSpec((pl.Squeezed(), C, HW), lambda b: (b, 0, 0)),
                pl.BlockSpec((hidden, C), lambda b: (0, 0)),
                pl.BlockSpec((C, hidden), lambda b: (0, 0)),
            ],
            out_specs=pl.BlockSpec((pl.Squeezed(), C, HW), lambda b: (b, 0, 0)),
        ),
        compiler_params=pltpu.CompilerParams(
            dimension_semantics=("parallel",),
            vmem_limit_bytes=vmem_limit,
        ),
        cost_estimate=cost,
    )(x3, w1, w2)


# ------------------------------ two-phase kernels -----------------------------------

def _pool_fc_kernel(x_ref, w1_ref, w2_ref, scale_ref, sum_acc, max_acc, *,
                    inv_hw, tail_valid):
    # Grid: (B, cdiv(HW, t_hw)); reduction axis (lane tiles) is last / "arbitrary".
    # tail_valid is None when HW % t_hw == 0; otherwise the valid lane count of the
    # last (ragged) tile — only that tile pays for the mask (iota + 2 selects).
    t = pl.program_id(1)
    nt = pl.num_programs(1)

    @pl.when(t == 0)
    def _init():
        sum_acc[...] = jnp.zeros(sum_acc.shape, sum_acc.dtype)
        max_acc[...] = jnp.full(max_acc.shape, -jnp.inf, max_acc.dtype)

    x = x_ref[...].astype(jnp.float32)                                        # (C, t_hw)

    if tail_valid is None:
        sum_acc[...] += jnp.sum(x, axis=-1, keepdims=True)
        max_acc[...] = jnp.maximum(max_acc[...],
                                   jnp.max(x, axis=-1, keepdims=True))
    else:
        @pl.when(t < nt - 1)
        def _bulk():
            sum_acc[...] += jnp.sum(x, axis=-1, keepdims=True)
            max_acc[...] = jnp.maximum(max_acc[...],
                                       jnp.max(x, axis=-1, keepdims=True))

        @pl.when(t == nt - 1)
        def _tail():
            lane = jax.lax.broadcasted_iota(jnp.int32, x.shape, 1)
            mask = lane < tail_valid
            sum_acc[...] += jnp.sum(jnp.where(mask, x, 0.0), axis=-1, keepdims=True)
            max_acc[...] = jnp.maximum(
                max_acc[...],
                jnp.max(jnp.where(mask, x, -jnp.inf), axis=-1, keepdims=True))

    @pl.when(t == nt - 1)
    def _finalize():
        avg = sum_acc[...] * inv_hw
        scale_ref[...] = _fused_fc_scale(
            avg, max_acc[...], w1_ref[...], w2_ref[...]).astype(scale_ref.dtype)


def _apply_scale_kernel(x_ref, scale_ref, o_ref):
    # Pure bandwidth: out = scale (C, 1) * x (C, t_hw), in the native dtype
    # (halves vreg traffic for bf16 on v6e/v7x); lane-dense stores; OOB lanes of the
    # ragged last tile are dropped by the Pallas edge-block writeback.
    o_ref[...] = (scale_ref[...].astype(o_ref.dtype) * x_ref[...]).astype(o_ref.dtype)


def _pick_lane_tile(hw, c, itemsize, budget_bytes):
    """Largest multiple-of-128 lane tile whose pipelined footprint (2 in + 2 out
    buffers) fits the budget.  The tile need NOT divide hw (cdiv grid + masked tail),
    so awkward spatial sizes keep wide lane-dense tiles."""
    cap = pl.cdiv(hw, LANE) * LANE
    t = LANE
    for cand in (4096, 2048, 1024, 512, 256, 128):
        if cand <= cap and 4 * c * cand * itemsize <= budget_bytes:
            t = cand
            break
    if t >= hw:
        t = hw            # one tile; last-dim == full array dim is always legal
    return t


def _channel_attention_two_phase(x3, w1, w2, vmem_limit):
    B, C, HW = x3.shape
    hidden = w1.shape[0]
    itemsize = x3.dtype.itemsize
    w_bytes = w1.size * w1.dtype.itemsize + w2.size * w2.dtype.itemsize

    tile_budget = min(24 << 20, max(8 << 20, vmem_limit // 3))
    t_hw = _pick_lane_tile(HW, C, itemsize, tile_budget)
    n_t = pl.cdiv(HW, t_hw)
    tail = HW - (n_t - 1) * t_hw
    tail_valid = None if tail == t_hw else tail     # static: only last tile is masked

    # Phase 1: pooled (avg, max) reduction over lane tiles + tiny fused FC -> (B, C, 1).
    pool_cost = pl.CostEstimate(
        flops=int(B * (2 * C * HW + 8 * hidden * C)),
        transcendentals=int(B * C),
        bytes_accessed=int(B * C * HW * itemsize + w_bytes + B * C * 4),
    )
    scale = pl.pallas_call(
        functools.partial(_pool_fc_kernel, inv_hw=1.0 / HW, tail_valid=tail_valid),
        out_shape=jax.ShapeDtypeStruct((B, C, 1), jnp.float32),
        grid_spec=pltpu.PrefetchScalarGridSpec(
            num_scalar_prefetch=0,
            grid=(B, n_t),
            in_specs=[
                pl.BlockSpec((pl.Squeezed(), C, t_hw), lambda b, t: (b, 0, t)),
                pl.BlockSpec((hidden, C), lambda b, t: (0, 0)),
                pl.BlockSpec((C, hidden), lambda b, t: (0, 0)),
            ],
            out_specs=pl.BlockSpec((pl.Squeezed(), C, 1), lambda b, t: (b, 0, 0)),
            scratch_shapes=[
                pltpu.VMEM((C, 1), jnp.float32),    # running sum
                pltpu.VMEM((C, 1), jnp.float32),    # running max
            ],
        ),
        compiler_params=pltpu.CompilerParams(
            dimension_semantics=("parallel", "arbitrary"),
            vmem_limit_bytes=vmem_limit),
        cost_estimate=pool_cost,
    )(x3, w1, w2)

    # Phase 2: out = scale * x, tiled elementwise, both grid axes independent
    # (shards across v7x's two TensorCores even for B == 1).
    mul_cost = pl.CostEstimate(
        flops=int(B * C * HW),
        transcendentals=0,
        bytes_accessed=int(2 * B * C * HW * itemsize + B * C * 4),
    )
    out3 = pl.pallas_call(
        _apply_scale_kernel,
        out_shape=jax.ShapeDtypeStruct((B, C, HW), x3.dtype),
        grid_spec=pltpu.PrefetchScalarGridSpec(
            num_scalar_prefetch=0,
            grid=(B, n_t),
            in_specs=[
                pl.BlockSpec((pl.Squeezed(), C, t_hw), lambda b, t: (b, 0, t)),
                pl.BlockSpec((pl.Squeezed(), C, 1), lambda b, t: (b, 0, 0)),
            ],
            out_specs=pl.BlockSpec((pl.Squeezed(), C, t_hw), lambda b, t: (b, 0, t)),
        ),
        compiler_params=pltpu.CompilerParams(
            dimension_semantics=("parallel", "parallel"),
            vmem_limit_bytes=vmem_limit),
        cost_estimate=mul_cost,
    )(x3, scale)
    return out3


# ----------------------------------- wrapper ----------------------------------------

def channel_attention(x, w1, w2, path="auto"):
    """ChannelAttention forward.

    x:  (B, C, H, W)                      (PyTorch NCHW)
    w1: (C//16, C)  == Conv2d(C, C//16, 1, bias=False).weight[..., 0, 0]
    w2: (C, C//16)  == Conv2d(C//16, C, 1, bias=False).weight[..., 0, 0]
    Returns (B, C, H, W), same dtype as x.
    """
    B, C, H, W = x.shape
    hidden = w1.shape[0]
    if hidden < 1:
        raise ValueError("in_planes must be >= 16 (ratio-16 squeeze needs hidden >= 1)")

    HW = H * W
    itemsize = x.dtype.itemsize
    x3 = x.reshape(B, C, HW)   # contiguity-preserving: free, no HBM pass

    vmem_cap = _vmem_capacity_bytes()
    vmem_limit = _derive_vmem_limit(vmem_cap)

    # Single-pass footprint: 2x double-buffered input + 2x double-buffered output +
    # in-kernel temporaries (native product slab + f32 pooling copy) + margin.
    block_native = C * HW * itemsize
    w_bytes = w1.size * w1.dtype.itemsize + w2.size * w2.dtype.itemsize
    single_footprint = 5 * block_native + C * HW * 4 + 2 * w_bytes + (2 << 20)

    if path == "auto":
        # Single-pass does 2 HBM passes vs. 3 for two-phase, so take it whenever the
        # slab (plus 16 MiB of slack over our estimate) fits the per-generation limit.
        path = "single" if single_footprint + (16 << 20) <= vmem_limit else "two_phase"

    if path == "single":
        out3 = _channel_attention_single_pass(x3, w1, w2, vmem_limit)
    elif path == "two_phase":
        out3 = _channel_attention_two_phase(x3, w1, w2, vmem_limit)
    else:
        raise ValueError(f"unknown path: {path}")

    return out3.reshape(B, C, H, W)


def channel_attention_ref(x, w1, w2):
    avg = jnp.mean(x, axis=(2, 3))                        # (B, C)
    mx = jnp.max(x, axis=(2, 3))                          # (B, C)

    def fc(p):                                            # (B, C)
        h = jnp.maximum(p @ w1.T, 0.0)                    # (B, hidden)
        return h @ w2.T                                   # (B, C)

    scale = jax.nn.sigmoid(fc(avg) + fc(mx))              # (B, C)
    return scale[:, :, None, None] * x


if __name__ == "__main__":
    # in_planes must be >= 16 since fc squeezes by a hardcoded factor 16.
    B, C, H, W = 2, 32, 16, 16
    hidden = C // 16

    key = jax.random.PRNGKey(0)
    kx, k1, k2 = jax.random.split(key, 3)
    x = jax.random.normal(kx, (B, C, H, W), dtype=jnp.float32)
    w1 = jax.random.normal(k1, (hidden, C), dtype=jnp.float32) * 0.1
    w2 = jax.random.normal(k2, (C, hidden), dtype=jnp.float32) * 0.1

    out = jax.block_until_ready(channel_attention(x, w1, w2))
    ref = channel_attention_ref(x, w1, w2)
    assert out.shape == (B, C, H, W)
    assert jnp.max(jnp.abs(out - ref)) < 1e-5

    # Non-128-multiple spatial size (HW=300): single-pass uses a full-dim (unaligned)
    # block with no wrapper pad/slice; two-phase uses a cdiv grid (t_hw=256) with a
    # masked ragged tail tile in the pooling kernel.
    x2 = jax.random.normal(kx, (B, C, 15, 20), dtype=jnp.float32)
    ref2 = channel_attention_ref(x2, w1, w2)
    out_sp = jax.block_until_ready(channel_attention(x2, w1, w2, path="single"))
    out_tp = jax.block_until_ready(channel_attention(x2, w1, w2, path="two_phase"))
    assert jnp.max(jnp.abs(out_sp - ref2)) < 1e-5
    assert jnp.max(jnp.abs(out_tp - ref2)) < 1e-5

    # Tiny image forced through two-phase: a single lane tile equal to the full
    # (unaligned) spatial dim, exercising the n_t == 1 init/finalize-in-one-step path.
    x3 = jax.random.normal(kx, (B, C, 10, 10), dtype=jnp.float32)
    ref3 = channel_attention_ref(x3, w1, w2)
    out3 = jax.block_until_ready(channel_attention(x3, w1, w2, path="two_phase"))
    assert jnp.max(jnp.abs(out3 - ref3)) < 1e-5

    print("KERNEL_OK")
</pallas_src>

<mosaic_0001>
module attributes {stable_mosaic.version = 11 : i64} {
  func.func @_single_pass_kernel(%arg0: i32, %arg1: memref<1x32x256xf32, #tpu.memory_space<vmem>>, %arg2: memref<2x32xf32, #tpu.memory_space<vmem>>, %arg3: memref<32x2xf32, #tpu.memory_space<vmem>>, %arg4: memref<1x32x256xf32, #tpu.memory_space<vmem>>) attributes {dimension_semantics = [#tpu.dimension_semantics<parallel>], iteration_bounds = array<i64: 2>, scalar_prefetch = 0 : i64, scratch_operands = 0 : i64, tpu.core_type = #tpu.core_type<tc>, window_params = [{transform_indices = @transform_0, window_bounds = array<i64: 1, 32, 256>}, {pipeline_mode = #tpu.pipeline_mode<synchronous>, transform_indices = @transform_1, window_bounds = array<i64: 2, 32>}, {pipeline_mode = #tpu.pipeline_mode<synchronous>, transform_indices = @transform_2, window_bounds = array<i64: 32, 2>}, {transform_indices = @transform_3, window_bounds = array<i64: 1, 32, 256>}]} {
    %c0 = arith.constant 0 : index
    %c0_0 = arith.constant 0 : index
    %c0_1 = arith.constant 0 : index
    %0 = vector.load %arg1[%c0, %c0_0, %c0_1] : memref<1x32x256xf32, #tpu.memory_space<vmem>>, vector<1x32x256xf32>
    %1 = vector.shape_cast %0 : vector<1x32x256xf32> to vector<32x256xf32>
    %cst = arith.constant dense<0.000000e+00> : vector<32xf32>
    %2 = vector.multi_reduction <add>, %1, %cst [1] : vector<32x256xf32> to vector<32xf32>
    %3 = vector.shape_cast %2 : vector<32xf32> to vector<32x1xf32>
    %cst_2 = arith.constant 3.906250e-03 : f32
    %4 = vector.broadcast %cst_2 : f32 to vector<32x1xf32>
    %5 = arith.mulf %3, %4 : vector<32x1xf32>
    %cst_3 = arith.constant dense<0xFF800000> : vector<32xf32>
    %6 = vector.multi_reduction <maximumf>, %1, %cst_3 [1] : vector<32x256xf32> to vector<32xf32>
    %7 = vector.shape_cast %6 : vector<32xf32> to vector<32x1xf32>
    %c0_4 = arith.constant 0 : index
    %c0_5 = arith.constant 0 : index
    %8 = vector.load %arg2[%c0_4, %c0_5] : memref<2x32xf32, #tpu.memory_space<vmem>>, vector<2x32xf32>
    %c0_6 = arith.constant 0 : index
    %c0_7 = arith.constant 0 : index
    %9 = vector.load %arg3[%c0_6, %c0_7] : memref<32x2xf32, #tpu.memory_space<vmem>>, vector<32x2xf32>
    %10 = tpu.iota {dimensions = array<i32: 1>} : vector<32x2xi32>
    %c0_i32 = arith.constant 0 : i32
    %11 = vector.broadcast %c0_i32 : i32 to vector<32x2xi32>
    %12 = arith.cmpi eq, %10, %11 : vector<32x2xi32>
    %13 = vector.shape_cast %5 : vector<32x1xf32> to vector<32x1xf32>
    %14 = vector.broadcast %13 : vector<32x1xf32> to vector<32x2xf32>
    %15 = vector.shape_cast %7 : vector<32x1xf32> to vector<32x1xf32>
    %16 = vector.broadcast %15 : vector<32x1xf32> to vector<32x2xf32>
    %17 = arith.select %12, %14, %16 : vector<32x2xi1>, vector<32x2xf32>
    %cst_8 = arith.constant dense<0.000000e+00> : vector<2x2xf32>
    %18 = tpu.matmul %8, %17, %cst_8 {dimension_numbers = #tpu.dot_dimension_numbers<[1], [0], [0], [1], [0, 0, 1, 1], [], []>} : vector<2x32xf32>, vector<32x2xf32>, vector<2x2xf32> -> vector<2x2xf32>
    %cst_9 = arith.constant 0.000000e+00 : f32
    %19 = vector.broadcast %cst_9 : f32 to vector<2x2xf32>
    %20 = arith.maximumf %18, %19 : vector<2x2xf32>
    %cst_10 = arith.constant dense<0.000000e+00> : vector<32x2xf32>
    %21 = tpu.matmul %9, %20, %cst_10 {dimension_numbers = #tpu.dot_dimension_numbers<[1], [0], [0], [1], [0, 0, 1, 1], [], []>} : vector<32x2xf32>, vector<2x2xf32>, vector<32x2xf32> -> vector<32x2xf32>
    %22 = vector.extract_strided_slice %21 {offsets = [0, 0], sizes = [32, 1], strides = [1, 1]} : vector<32x2xf32> to vector<32x1xf32>
    %23 = vector.extract_strided_slice %21 {offsets = [0, 1], sizes = [32, 1], strides = [1, 1]} : vector<32x2xf32> to vector<32x1xf32>
    %24 = arith.addf %22, %23 : vector<32x1xf32>
    %25 = arith.negf %24 : vector<32x1xf32>
    %26 = math.exp %25 : vector<32x1xf32>
    %cst_11 = arith.constant 1.000000e+00 : f32
    %27 = vector.broadcast %cst_11 : f32 to vector<32x1xf32>
    %28 = arith.addf %27, %26 : vector<32x1xf32>
    %29 = arith.divf %27, %28 : vector<32x1xf32>
    %c0_12 = arith.constant 0 : index
    %c0_13 = arith.constant 0 : index
    %c0_14 = arith.constant 0 : index
    %30 = vector.load %arg1[%c0_12, %c0_13, %c0_14] : memref<1x32x256xf32, #tpu.memory_space<vmem>>, vector<1x32x256xf32>
    %31 = vector.shape_cast %30 : vector<1x32x256xf32> to vector<32x256xf32>
    %32 = vector.broadcast %29 : vector<32x1xf32> to vector<32x256xf32>
    %33 = arith.mulf %32, %31 : vector<32x256xf32>
    %c0_15 = arith.constant 0 : index
    %c0_16 = arith.constant 0 : index
    %c0_17 = arith.constant 0 : index
    %34 = vector.load %arg4[%c0_15, %c0_16, %c0_17] : memref<1x32x256xf32, #tpu.memory_space<vmem>>, vector<1x32x256xf32>
    %35 = vector.shape_cast %34 : vector<1x32x256xf32> to vector<32x256xf32>
    %36 = vector.shape_cast %33 : vector<32x256xf32> to vector<1x32x256xf32>
    tpu.vector_store %arg4[%c0_15, %c0_16, %c0_17], %36 {strides = array<i32>} : memref<1x32x256xf32, #tpu.memory_space<vmem>>, vector<1x32x256xf32>,
    return
  }
  func.func @transform_0(%arg0: i32) -> (i32, i32, i32) {
    %c0_i32 = arith.constant 0 : i32
    %c0_i32_0 = arith.constant 0 : i32
    %c0_i32_1 = arith.constant 0 : i32
    return %arg0, %c0_i32, %c0_i32_0 : i32, i32, i32
  }
  func.func @transform_1(%arg0: i32) -> (i32, i32) {
    %c0_i32 = arith.constant 0 : i32
    %c0_i32_0 = arith.constant 0 : i32
    %c0_i32_1 = arith.constant 0 : i32
    return %c0_i32, %c0_i32_0 : i32, i32
  }
  func.func @transform_2(%arg0: i32) -> (i32, i32) {
    %c0_i32 = arith.constant 0 : i32
    %c0_i32_0 = arith.constant 0 : i32
    %c0_i32_1 = arith.constant 0 : i32
    return %c0_i32, %c0_i32_0 : i32, i32
  }
  func.func @transform_3(%arg0: i32) -> (i32, i32, i32) {
    %c0_i32 = arith.constant 0 : i32
    %c0_i32_0 = arith.constant 0 : i32
    %c0_i32_1 = arith.constant 0 : i32
    return %arg0, %c0_i32, %c0_i32_0 : i32, i32, i32
  }
}

</mosaic_0001>

<bundles_post_ra>
// kernel: tpu_custom_call.1
= control target key start
LH: loop header
LB: loop body
LE: loop exit
PB: predicated region body
PF: predicated region fallthrough
CT: control target
= control target key end

     0   :  { %8 = vsyncpa [#allocation3], 0  ;;  %s1065_s0 = inlined_call_operand.hbm [shape: f32[2,32,256], index: 0, kind: input, shape index: {}]   ;;  %s1066_s1 = inlined_call_operand.vmem [shape: f32[2,32], index: 1, kind: input, shape index: {}]   ;;  %s1067_s2 = inlined_call_operand.vmem [shape: f32[32,2], index: 2, kind: input, shape index: {}]   ;;  %s1068_s3 = inlined_call_operand.hbm [shape: f32[2,32,256], index: 3, kind: output, shape index: {}]  }
   0x1   :  { %10 = vsyncpa [#allocation3 + $0x1], 0 }
   0x2   :  { %11 = vsyncpa [#allocation4], 0 }
   0x3   :  { %13 = vsyncpa [#allocation4 + $0x1], 0  ;;  %s844_s12 = smov 0   ;;  %s846_s13 = smov 0  }
   0x4   :  { %s848_s14 = smov 0   ;;  %s850_s15 = smov 0  }
   0x5 LB: > { %s865_s16 = sadd.s32 4294967295, %s811_s15   ;;  %s581_s17 = sadd.s32 4294967294, %s811_s15   ;;  %s811_s15 = sphi %s850_s15, %s1081_s15   ;;  %s807_s14 = sphi %s848_s14, %s1080_s14   ;;  %s803_s13 = sphi %s846_s13, %s1079_s13   ;;  %s799_s12 = sphi %s844_s12, %s1078_s12  }
   0x6   : > { %s869_s18 = sadd.s32 1, %s811_s15   ;;  %s26_s19 = sadd.s32 1, %s807_s14 }
   0x7   : > { %s23_s20 = ssub.s32 %s811_s15, %s869_s18  ;;  %p33_p0 = scmp.ne.s32.totalorder %s807_s14, %s803_s13 }
   0x8   : > { %p24_p1 = scmp.eq.s32.totalorder %s23_s20, 0  ;;  %p34_p2 = scmp.eq.s32.totalorder %s811_s15, 0 }
   0x9   : > { %p39_p3 = scmp.ne.s32.totalorder %s803_s13, %s799_s12  ;;  %p40_p4 = scmp.eq.s32.totalorder %s865_s16, 0 }
   0xa   : > { %s881_s21 = scalar_select %p24_p1, %s807_s14, %s26_s19  }
   0xb   : > { %p883_p5 = por %p34_p2, %p33_p0  ;;  %p887_p6 = por %p40_p4, %p39_p3 }
   0xc   : > { %p105_p7 = scmp.eq.s32.totalorder %s865_s16, 1  ;;  %p111_p8 = scmp.eq.s32.totalorder %s581_s17, 1 }
   0xd   : > { %p654_p10 = scmp.lt.s32.totalorder %s811_s15, 2  ;;  %s137_s26 = sand.u32 1, %s807_s14  }
   0xe   : > { %p894_p11 = por %p105_p7, %p33_p0  ;;  %p898_p12 = por %p111_p8, %p39_p3 }
   0xf   : > { %s605_s27 = sshll.u32 %s811_s15, 10  ;;  %s584_s28 = sshll.u32 %s137_s26, 6 }
  0x10   : > { %s1072_s24 = scalar_select %p894_p11, 1, 0 }
  0x11   : > { %s1073_s25 = scalar_select %p898_p12, 1, 0 }
  0x12   : > { %s907_s4 = scalar_lea.hbm %s1065_s0, %s605_s27  ;;  %s141_s5 = scalar_lea.vmem [#allocation2], %s584_s28 }
  0x13   : > { %s148_s6 = sshll.u32 %s141_s5, 4  ;;  %p911_p13 = pnand %p654_p10, %p883_p5  ;;  %s915_s6 = int_to_ptr.vmem [resolvable:$true] %s148_s6 }
  0x14   : > { %s917_s8 = scalar_lea.sflag [#allocation3], %s137_s26  ;;  %s715_s9 = scalar_lea.hbm %s907_s4, 1024 }
  0x15   : > { %p716_p0 = scmp.ne.s32.totalorder %s907_s4, %s715_s9  ;;  %p717_p1 = pneg %p911_p13 }
  0x16   : > { %s720_s17 = scalar_lea.hbm %s1065_s0, 2048  ;;  %p721_p4 = scmp.lt.u32.totalorder %s907_s4, %s1065_s0 }
  0x17   : > { %p718_p2 = pnand %p717_p1, %p716_p0  ;;  %p722_p5 = scmp.lt.u32.totalorder %s720_s17, %s715_s9 }
  0x18   : > { %p724_p8 = scmp.lt.u32.totalorder %s715_s9, %s907_s4 }
  0x19   : > { %p719_p3 = pneg %p718_p2  ;;  %p723_p7 = por %p722_p5, %p721_p4 }
  0x1b   : > { %p725_p10 = por %p724_p8, %p723_p7 }
  0x1d   : > { %p726_p9 = pnand %p725_p10, %p719_p3 }
  0x1f   : > { %729 = shalt.err (!%p726_p9)
}
  0x20   : > { %s730_s22 = scalar_lea.vmem %s915_s6, 1024  ;;  %s813_s26 = smov [#allocation2]  }
  0x21   : > { %p731_p0 = scmp.ne.s32.totalorder %s915_s6, %s730_s22  ;;  %s735_s27 = sshll.u32 %s813_s26, 4  ;;  %s736_s27 = int_to_ptr.vmem [resolvable:$false] %s735_s27 }
  0x22   : > { %s737_s28 = scalar_lea.vmem %s736_s27, 2048  ;;  %p738_p11 = scmp.lt.s32.totalorder %s915_s6, %s736_s27 }
  0x23   : > { %p733_p2 = pnand %p731_p0, %p717_p1  ;;  %p739_p4 = scmp.lt.s32.totalorder %s737_s28, %s730_s22 }
  0x25   : > { %p734_p12 = pneg %p733_p2  ;;  %p740_p5 = por %p739_p4, %p738_p11 }
  0x27   : > { %p741_p7 = pnand %p740_p5, %p734_p12 }
  0x29   : > { %744 = shalt.err (!%p741_p7)
}
  0x2a   : > { %s814_s29 = smov 256   ;;  %s815_s30 = smov 16  }
  0x2b   : > { %649 = dma.hbm_to_vmem [thread:$0]  (!%p911_p13), %s907_s4, 1024, %s915_s6, %s917_s8, %s814_s29, %s814_s29, %s815_s30  }
  0x2c   : > { %p587_p9 = scmp.ge.s32.totalorder %s811_s15, 1  ;;  %p156_p1 = scmp.lt.s32.totalorder %s811_s15, 3 }
  0x2e   : > { %p157_p3 = pnand %p587_p9, %p156_p1 }
  0x2f   : > { %s948_s5 = sand.u32 (!%p157_p3), 1, %s803_s13  }
  0x30   : > { %160 = sbr.rel (%p157_p3) target bundleno = 944 (0x3b0), region = 32  ;;  %s588_s9 = sshll.u32 (!%p157_p3), %s948_s5, 6 }
  0x31   : > { %s163_s10 = scalar_lea.sflag (!%p157_p3), [#allocation3], %s948_s5  ;;  %s166_s11 = scalar_lea.vmem (!%p157_p3), [#allocation2], %s588_s9 }
  0x37   : > { %790 = dma.done.wait (%p887_p6), %s163_s10, 1024  }
  0x38   : > { %792 = vsyncadd (%p887_p6), %s163_s10, 4294966272  ;;  %v958_v0 = vld [vmem:[%s166_s11] sm:$0xff]  ;;  %v960_v1 = vld [vmem:[%s166_s11 + $0x8] sm:$0xff]  ;;  %v816_v16 = vmov 0.0|0.0   ;;  %vm817_vm0 = vmmov 0   ;;  %v818_v17 = vmov 0.0   ;;  %v230_v18 = vlaneseq }
  0x39   : > { %v962_v2 = vld [vmem:[%s166_s11 + $0x10] sm:$0xff]  ;;  %v213_v3 = vmax.f32 %v958_v0, %v960_v1  ;;  %v197_v4 = vadd.f32 %v960_v1, %v958_v0  ;;  %v968_v5 = vld [vmem:[%s166_s11 + $0x18] sm:$0xff]  ;;  %v978_v10 = vld [vmem:[%s166_s11 + $0x20] sm:$0xff]  ;;  %636 = vmatprep.subr.bf16.mxu0 %v816_v16  ;;  %625 = vmatprep.mubr.msk.f32.mxu0 %vm817_vm0, %v818_v17  ;;  %vm237_vm2 = vcmask 261120   ;;  %vm312_vm3 = vcmask 15360   ;;  %s819_s27 = smov 127  }
  0x3a   : > { %v216_v6 = vmax.f32 %v962_v2, %v968_v5  ;;  %v200_v7 = vadd.f32 %v968_v5, %v962_v2  ;;  %v974_v8 = vld [vmem:[%s166_s11 + $0x30] sm:$0xff]  ;;  %v976_v9 = vld [vmem:[%s166_s11 + $0x38] sm:$0xff]  ;;  %v980_v11 = vld [vmem:[%s166_s11 + $0x28] sm:$0xff]  ;;  %v231_v21 = vand.u32 127, %v230_v18  ;;  %vm325_vm4 = vcmask 1041408   ;;  %s188_s28 = scalar_lea.vmem [#allocation5], %s588_s9 }
  0x3b   : > { %214 = vmax.xlane.f32.xlu1 %v213_v3  ;;  %198 = vadd.xlane.f32.xlu0 %v197_v4  ;;  %v206_v12 = vadd.f32 %v976_v9, %v974_v8  ;;  %v203_v13 = vadd.f32 %v980_v11, %v978_v10  ;;  %v222_v14 = vmax.f32 %v974_v8, %v976_v9  ;;  %v225_v38 = vld [vmem:[%s1066_s1] sm:$0x3]  ;;  %v227_v43 = vld [vmem:[%s1067_s2 + $0x8] sm:$0xff]  ;;  %v228_v44 = vld [vmem:[%s1067_s2 + $0x10] sm:$0xff]  ;;  %v820_v50 = vmov 0   ;;  %s508_s29 = sshll.u32 %s188_s28, 4  ;;  %s1014_s29 = int_to_ptr.vmem [resolvable:$true] %s508_s29 }
  0x3c   : > { %v219_v15 = vmax.f32 %v978_v10, %v980_v11  ;;  %vm232_vm1 = vcmp.eq.s32.totalorder %v231_v21, 0  ;;  %v226_v39 = vld [vmem:[%s1067_s2] sm:$0xff]  ;;  %v229_v45 = vld [vmem:[%s1067_s2 + $0x18] sm:$0xff]  ;;  %697 = vset.pattern.permute.xlu1 %v820_v50  ;;  %698 = vset.pattern.permute.xlu0 %v820_v50  ;;  %s606_s30 = sshll.u32 %s865_s16, 10  ;;  %s495_s16 = scalar_lea.sflag [#allocation4], %s948_s5 }
  0x3d   : > { %630 = vmatprep.mubr.msk.f32.mxu1 %vm312_vm3, %v226_v39  ;;  %s1019_s11 = scalar_lea.hbm %s1068_s3, %s606_s30  ;;  %s745_s23 = scalar_lea.vmem %s1014_s29, 1024 }
  0x3e   : > { %p746_p6 = scmp.ne.s32.totalorder %s1014_s29, %s745_s23  ;;  %p1075_p11 = scmp.ne.s32.totalorder %s1072_s24, 0 }
  0x3f   : > { %217 = vmax.xlane.f32.xlu1 %v216_v6  ;;  %201 = vadd.xlane.f32.xlu0 %v200_v7  ;;  %s821_s4 = smov [#allocation5]  }
  0x40   : > { %p747_p12 = pnand %p746_p6, %p1075_p11  ;;  %s749_s6 = sshll.u32 %s821_s4, 4  ;;  %s750_s6 = int_to_ptr.vmem [resolvable:$false] %s749_s6 }
  0x41   : > { %s751_s7 = scalar_lea.vmem %s750_s6, 2048  ;;  %p752_p8 = scmp.lt.s32.totalorder %s1014_s29, %s750_s6 }
  0x42   : > { %p748_p13 = pneg %p747_p12  ;;  %p753_p10 = scmp.lt.s32.totalorder %s751_s7, %s745_s23 }
  0x43   : > { %207 = vadd.xlane.f32.xlu1 %v206_v12  ;;  %204 = vadd.xlane.f32.xlu0 %v203_v13 }
  0x44   : > { %p754_p0 = por %p753_p10, %p752_p8 }
  0x46   : > { %p755_p2 = pnand %p754_p0, %p748_p13 }
  0x47   : > { %223 = vmax.xlane.f32.xlu1 %v222_v14  ;;  %220 = vmax.xlane.f32.xlu0 %v219_v15 }
  0xc8   : > { %v215_v19 = vpop.xlane.xlu1 %214  ;;  %v199_v20 = vpop.xlane.xlu0 %198 }
  0xc9   : > { %v209_v22 = vmul.f32 0.00390625, %v199_v20 }
  0xcb   : > { %v233_v26 = vsel %vm232_vm1, %v209_v22, %v215_v19 }
  0xcc   : > { %v218_v23 = vpop.xlane.xlu1 %217  ;;  %v202_v24 = vpop.xlane.xlu0 %201 }
  0xcd   : > { %v210_v25 = vmul.f32 0.00390625, %v202_v24 }
  0xcf   : > { %v234_v27 = vsel %vm232_vm1, %v210_v25, %v218_v23 }
  0xd0   : > { %v208_v28 = vpop.xlane.xlu1 %207  ;;  %v205_v29 = vpop.xlane.xlu0 %204  ;;  %v637_v30 = vpack.c.bf16 %v234_v27, %v233_v26 }
  0xd1   : > { %v212_v31 = vmul.f32 0.00390625, %v208_v28  ;;  %v211_v32 = vmul.f32 0.00390625, %v205_v29 }
  0xd2   : > { %638 = vmatpush3.bf16.msra.mxu0 %v637_v30 }
  0xd3   : > { %639 = vmatprep.subr.bf16.mxu0 %v816_v16 }
  0xd4   : > { %v224_v33 = vpop.xlane.xlu1 %223  ;;  %v221_v34 = vpop.xlane.xlu0 %220 }
  0xd5   : > { %v236_v35 = vsel %vm232_vm1, %v212_v31, %v224_v33  ;;  %v235_v36 = vsel %vm232_vm1, %v211_v32, %v221_v34 }
  0xd6   : > { %v640_v37 = vpack.c.bf16 %v236_v35, %v235_v36 }
  0xd8   : > { %641 = vmatpush3.bf16.msra.mxu0 %v640_v37 }
  0xdb   : > { %626 = vmatmul.mubr.msk.f32.vlgmr.msra.gmra.mrb[0].mxu0 %vm237_vm2, %v225_v38 }
 0x1ae   : > { %v307_v40 = vpop.f32.mrb[0].mxu0 }
 0x1af   : > { %v311_v41 = vmax.f32 %v307_v40, 0.0  ;;  %v627_v42 = vpop.f32.mrb[1].mxu0 }
 0x1b1   : > { %628 = vmatprep.subr.msk.mxu1 %vm325_vm4, %v311_v41 }
 0x1b2   : > { %629 = vmatpush3.msk.msra.mxu1 %vm325_vm4, %v311_v41 }
 0x1b3   : > { %631 = vmatmul.mubr.msk.f32.vlgmr.msra.gmra.mrb[0].mxu1 %vm312_vm3, %v227_v43 }
 0x1b4   : > { %633 = vmatprep.mubr.msk.f32.mxu1 %vm312_vm3, %v228_v44 }
 0x1b7   : > { %634 = vmatmul.mubr.msk.f32.gmra.mrb[2].mxu1 %vm312_vm3, %v229_v45 }
 0x286   : > { %v632_v46 = vpop.f32.mrb[0].mxu1 }
 0x287   : > { %420 = vrot.lane.b32.xlu1 %v632_v46, %s819_s27  ;;  %v395_v47 = vpop.f32.mrb[1].mxu1 }
 0x288   : > { %418 = vrot.lane.b32.xlu0 %v395_v47, %s819_s27 }
 0x28a   : > { %v635_v48 = vpop.f32.mrb[2].mxu1 }
 0x28b   : > { %v405_v49 = vpop.f32.mrb[3].mxu1 }
 0x28c   : > { %422 = vrot.lane.b32.xlu1 %v405_v49, %s819_s27 }
 0x290   : > { %424 = vrot.lane.b32.xlu1 %v635_v48, %s819_s27 }
 0x2f9   : > { %v421_v51 = vpop.permute.xlu1 %420 }
 0x2fa   : > { %v431_v52 = vadd.f32 %v632_v46, %v421_v51  ;;  %v419_v53 = vpop.permute.xlu0 %418 }
 0x2fb   : > { %v430_v54 = vadd.f32 %v419_v53, %v395_v47 }
 0x2fc   : > { %v597_v55 = vmul.f32 -1.442695, %v431_v52 }
 0x2fd   : > { %v596_v56 = vmul.f32 -1.442695, %v430_v54 }
 0x2fe   : > { %699 = vpow2.f32 %v597_v55  ;;  %v423_v57 = vpop.permute.xlu1 %422 }
 0x2ff   : > { %701 = vpow2.f32 %v596_v56  ;;  %v432_v58 = vadd.f32 %v423_v57, %v405_v49 }
 0x301   : > { %v598_v59 = vmul.f32 -1.442695, %v432_v58 }
 0x302   : > { %v425_v60 = vpop.permute.xlu1 %424 }
 0x303   : > { %703 = vpow2.f32 %v598_v59  ;;  %v433_v61 = vadd.f32 %v635_v48, %v425_v60 }
 0x305   : > { %v599_v62 = vmul.f32 -1.442695, %v433_v61 }
 0x307   : > { %705 = vpow2.f32 %v599_v62 }
 0x308   : > { %v700_v63 = vpop.eup %699 }
 0x309   : > { %v702_v3 = vpop.eup %701  ;;  %v447_v4 = vadd.f32 1.0, %v700_v63 }
 0x30a   : > { %v446_v6 = vadd.f32 1.0, %v702_v3 }
 0x30b   : > { %707 = vrcp.f32 %v447_v4 }
 0x30c   : > { %709 = vrcp.f32 %v446_v6 }
 0x30d   : > { %v704_v7 = vpop.eup %703 }
 0x30e   : > { %v448_v12 = vadd.f32 1.0, %v704_v7 }
 0x310   : > { %711 = vrcp.f32 %v448_v12 }
 0x311   : > { %v706_v13 = vpop.eup %705 }
 0x312   : > { %v449_v14 = vadd.f32 1.0, %v706_v13 }
 0x314   : > { %713 = vrcp.f32 %v449_v14 }
 0x315   : > { %v708_v15 = vpop.eup %707 }
 0x316   : > { %v710_v16 = vpop.eup %709  ;;  %465 = vperm.xlu1 %697, %v708_v15  }
 0x317   : > { %460 = vperm.xlu0 %698, %v710_v16  }
 0x31a   : > { %v712_v17 = vpop.eup %711 }
 0x31b   : > { %470 = vperm.xlu1 %697, %v712_v17  }
 0x31e   : > { %v714_v18 = vpop.eup %713 }
 0x31f   : > { %475 = vperm.xlu0 %698, %v714_v18  }
 0x395   : > { %v466_v19 = vpop.permute.xlu1 %465 }
 0x396   : > { %v480_v20 = vmul.f32 %v466_v19, %v962_v2  ;;  %v481_v21 = vmul.f32 %v466_v19, %v968_v5  ;;  %v461_v22 = vpop.permute.xlu0 %460 }
 0x397   : > { %v478_v23 = vmul.f32 %v461_v22, %v958_v0  ;;  %v479_v24 = vmul.f32 %v461_v22, %v960_v1 }
 0x398   : > { %488 = vst [vmem:[%s188_s28 + $0x10] sm:$0xff] %v480_v20  ;;  %489 = vst [vmem:[%s188_s28 + $0x18] sm:$0xff] %v481_v21 }
 0x399   : > { %486 = vst [vmem:[%s188_s28] sm:$0xff] %v478_v23  ;;  %487 = vst [vmem:[%s188_s28 + $0x8] sm:$0xff] %v479_v24 }
 0x39a   : > { %v471_v25 = vpop.permute.xlu1 %470 }
 0x39b   : > { %v482_v26 = vmul.f32 %v471_v25, %v978_v10  ;;  %v483_v2 = vmul.f32 %v471_v25, %v980_v11 }
 0x39d   : > { %490 = vst [vmem:[%s188_s28 + $0x20] sm:$0xff] %v482_v26  ;;  %491 = vst [vmem:[%s188_s28 + $0x28] sm:$0xff] %v483_v2 }
 0x39e   : > { %v476_v0 = vpop.permute.xlu0 %475 }
 0x39f   : > { %v484_v1 = vmul.f32 %v476_v0, %v974_v8  ;;  %v485_v5 = vmul.f32 %v476_v0, %v976_v9 }
 0x3a1   : > { %492 = vst [vmem:[%s188_s28 + $0x30] sm:$0xff] %v484_v1  ;;  %493 = vst [vmem:[%s188_s28 + $0x38] sm:$0xff] %v485_v5 }
 0x3a2   : > { %758 = shalt.err (!%p755_p2)
}
 0x3a3   : > { %s759_s8 = scalar_lea.hbm %s1019_s11, 1024  ;;  %s763_s20 = scalar_lea.hbm %s1068_s3, 2048 }
 0x3a4   : > { %p760_p4 = scmp.ne.s32.totalorder %s1019_s11, %s759_s8  ;;  %p764_p9 = scmp.lt.u32.totalorder %s1019_s11, %s1068_s3 }
 0x3a5   : > { %p765_p1 = scmp.lt.u32.totalorder %s763_s20, %s759_s8  ;;  %p767_p6 = scmp.lt.u32.totalorder %s759_s8, %s1019_s11 }
 0x3a6   : > { %p761_p5 = pnand %p760_p4, %p1075_p11 }
 0x3a7   : > { %p766_p3 = por %p765_p1, %p764_p9 }
 0x3a8   : > { %p762_p7 = pneg %p761_p5 }
 0x3a9   : > { %p768_p12 = por %p767_p6, %p766_p3 }
 0x3ab   : > { %p769_p13 = pnand %p768_p12, %p762_p7 }
 0x3ad   : > { %772 = shalt.err (!%p769_p13)
}
 0x3ae   : > { %s822_s27 = smov 256   ;;  %s823_s28 = smov 16  }
 0x3af   : > { %644 = dma.vmem_to_hbm [thread:$0]  (%p1075_p11), %s1014_s29, 1024, %s1019_s11, %s495_s16, %s822_s27, %s822_s27, %s823_s28  }
 0x3b0 PF: > { %s523_s30 = sand.u32 1, %s799_s12   ;;  %p1076_p8 = scmp.ne.s32.totalorder %s1073_s25, 0 }
 0x3b1   : > { %p1077_p10 = scmp.ge.s32.totalorder %s811_s15, 2  ;;  %s524_s9 = scalar_lea.sflag [#allocation4], %s523_s30 }
 0x3b3   : > { %p651_p0 = pnand %p1077_p10, %p1076_p8 }
 0x3b5   : > { %794 = dma.done.wait (!%p651_p0), %s524_s9, 1024  }
 0x3b6   : > { %796 = vsyncadd (!%p651_p0), %s524_s9, 4294966272  ;;  %p16_p2 = scmp.ge.s32.totalorder %s869_s18, 4   ;;  %s1078_s12 = smov %s803_s13 }
 0x3b7   : > { %s1079_s13 = smov %s807_s14  ;;  %s1080_s14 = smov %s881_s21 }
 0x3b8   : > { %s1081_s15 = smov %s869_s18  ;;  %18 = sbr.rel (!%p16_p2) target bundleno = 5 (0x5), region = 77 }
 0x3bf   :  { %529 = vsyncpa [#allocation3], 1 }
 0x3c0   :  { %531 = vsyncpa [#allocation3 + $0x1], 1 }
 0x3c1   :  { %532 = vsyncpa [#allocation4], 1 }
 0x3c2   :  { %534 = vsyncpa [#allocation4 + $0x1], 1 }

</bundles_post_ra>
